<compile_context>
chip_gen: v7x
topology: tpu7x:2x2x1
jax: 0.10.0
libtpu: 0.0.40
codegen_flags: <defaults>
</compile_context>

<pallas_src>
import functools

import jax
import jax.numpy as jnp
from jax import lax
from jax.experimental import pallas as pl
from jax.experimental.pallas import tpu as pltpu


def _round_up(n: int, m: int) -> int:
    return ((n + m - 1) // m) * m


def _tpu_plan() -> tuple[int, int]:
    """Return (physical VMEM bytes, TPU generation). Conservative fallbacks."""
    gen = 0
    try:
        kind = jax.devices()[0].device_kind.lower()
        for g in (7, 6, 5, 4, 3, 2):
            if f"v{g}" in kind:
                gen = g
                break
    except Exception:
        pass
    # v7x / unknown -> 64 MiB; v4/v5e/v6e -> 128 MiB
    phys = 64 * 1024 * 1024 if (gen == 0 or gen >= 7) else 128 * 1024 * 1024
    try:
        info = pltpu.get_tpu_info()
        phys = int(getattr(info, "vmem_capacity_bytes", phys))
    except Exception:
        pass
    return phys, gen


def _topk_kernel(x_ref, o_ref, *, k: int, unroll, use_packed: bool):
    """Per-row top-k mask + ReLU post-activation, scattered back to position.

    Iterative select-and-eliminate with first-index tie-break (matches
    torch.topk / lax.top_k ordering).

    bf16 path (`use_packed`): one cross-lane reduce per selection. The bf16
    value is mapped to a signed-sortable 16-bit key (exact for bf16), packed
    with the inverted column index into an int32, and a single jnp.max picks
    both the max value and its first index. Positive NaN sorts largest
    (matches torch); negative NaN sorts smallest.

    f32/other path: exact 2-reduce (max, then first-index among maxima).
    NaN rows select nothing (deviates from torch's "NaN is largest" rule).
    """
    R, D = x_ref.shape
    # (1, D) broadcast iota: no full-tile int32 temp.
    inv_col = (D - 1) - lax.broadcasted_iota(jnp.int32, (1, D), 1)
    keep0 = jnp.zeros((R, D), dtype=jnp.bool_)

    if use_packed:
        # bf16 -> f32 is exact; the bf16 bit pattern is the top 16 bits.
        bits = pltpu.bitcast(x_ref[...].astype(jnp.float32), jnp.int32)
        # monotone float->signed-sortable-int transform
        key = bits ^ ((bits >> 31) & jnp.int32(0x7FFFFFFF))
        # value key in hi 16 bits, inverted column (tie-break to lowest col) in lo 16
        packed0 = (key & jnp.int32(-65536)) | inv_col
        sentinel = jnp.int32(jnp.iinfo(jnp.int32).min)

        def body(_, carry):
            work, keep = carry
            best = jnp.max(work, axis=-1, keepdims=True)   # single XLU reduce
            sel = work == best                              # unique per row
            keep = jnp.logical_or(keep, sel)
            work = jnp.where(sel, sentinel, work)
            return work, keep

        _, keep = lax.fori_loop(0, k, body, (packed0, keep0), unroll=unroll)
    else:
        work0 = x_ref[...].astype(jnp.float32)
        neg_inf = jnp.float32(-jnp.inf)

        def body(_, carry):
            work, keep = carry
            cur_max = jnp.max(work, axis=-1, keepdims=True)                 # XLU reduce #1
            is_max = work == cur_max
            # first (lowest-index) occurrence of the max -> torch.topk tie-break
            best_inv = jnp.max(jnp.where(is_max, inv_col, -1),
                               axis=-1, keepdims=True)                      # XLU reduce #2
            sel = inv_col == best_inv
            keep = jnp.logical_or(keep, sel)
            work = jnp.where(sel, neg_inf, work)
            return work, keep

        _, keep = lax.fori_loop(0, k, body, (work0, keep0), unroll=unroll)

    # postact_fn = ReLU applied to selected values; everything else zero.
    # Re-read the resident VMEM tile instead of keeping x live across the loop.
    x = x_ref[...]
    vals = jnp.maximum(x, jnp.zeros((), x.dtype))
    o_ref[...] = jnp.where(keep, vals, jnp.zeros((), x.dtype)).astype(o_ref.dtype)


def topk_pallas(
    x: jax.Array,
    k: int,
    block_rows: int | None = None,
    vmem_limit_bytes: int | None = None,
) -> jax.Array:
    """TopK(k, postact_fn=ReLU) forward: keep top-k per last dim, ReLU, scatter back."""
    orig_shape = x.shape
    D = orig_shape[-1]
    if not (0 < k <= D):
        raise ValueError(f"k={k} must be in (0, {D}]")

    x2 = x.reshape(-1, D)
    rows = x2.shape[0]
    D_pad = _round_up(D, 128)               # lane-dense last dim -> unmasked stores

    # --- generation-specific VMEM plan -------------------------------------
    phys_vmem, gen = _tpu_plan()
    if phys_vmem >= 96 * 1024 * 1024:        # v5e / v6e class (128 MiB physical)
        default_limit = 96 * 1024 * 1024
        tile_budget = 64 * 1024 * 1024
    else:                                    # v7x class (64 MiB physical)
        default_limit = 40 * 1024 * 1024
        tile_budget = 22 * 1024 * 1024
    if vmem_limit_bytes is None:
        vmem_limit_bytes = default_limit

    use_packed = x.dtype == jnp.bfloat16
    in_bytes = x2.dtype.itemsize
    # live bytes per element: 2 double-buffered input bufs + 2 output bufs
    # + loop temporaries (work + keep + select/where temps).
    temp_bytes = 16 if use_packed else 20
    per_row_bytes = D_pad * (2 * in_bytes + 2 * in_bytes + temp_bytes)

    # --- pick the row block: big tiles, avoid row padding when possible ----
    if block_rows is None:
        target = max(8, (int(tile_budget // per_row_bytes) // 8) * 8)
        if gen >= 7 and rows >= 64:
            # 2 TensorCores: want >=4 row blocks so each core gets >=2 pipelined steps.
            cap = max(8, (((rows + 3) // 4) // 8) * 8)
            target = min(target, cap)
    else:
        target = max(8, (int(block_rows) // 8) * 8)

    if rows <= target:
        block_rows_eff = rows                # single block == full row extent, no pad
        rows_pad = rows
    else:
        block_rows_eff = None
        if rows % 8 == 0:
            c = target
            lower = max(8, target // 2)
            while c >= lower:                # divisor of rows near the target -> no pad
                if rows % c == 0:
                    block_rows_eff = c
                    break
                c -= 8
        if block_rows_eff is not None:
            rows_pad = rows
        else:
            block_rows_eff = target
            rows_pad = _round_up(rows, block_rows_eff)

    # --- pad: low-sentinel columns never win selection; zero rows sliced away
    xp = x2
    if D_pad != D:
        if jnp.issubdtype(x.dtype, jnp.floating):
            pad_val = -jnp.inf
        else:
            pad_val = int(jnp.iinfo(x.dtype).min)
        xp = jnp.pad(xp, ((0, 0), (0, D_pad - D)), constant_values=pad_val)
    if rows_pad != rows:
        xp = jnp.pad(xp, ((0, rows_pad - rows), (0, 0)))

    # full unroll only for small k; modest unroll avoids spill-bound bloat at large k
    unroll = True if k <= 8 else (4 if k <= 32 else 2)

    kernel = functools.partial(_topk_kernel, k=k, unroll=unroll, use_packed=use_packed)
    out = pl.pallas_call(
        kernel,
        out_shape=jax.ShapeDtypeStruct((rows_pad, D_pad), x.dtype),
        grid_spec=pltpu.PrefetchScalarGridSpec(
            num_scalar_prefetch=0,
            grid=(rows_pad // block_rows_eff,),
            in_specs=[pl.BlockSpec((block_rows_eff, D_pad), lambda i: (i, 0))],
            out_specs=pl.BlockSpec((block_rows_eff, D_pad), lambda i: (i, 0)),
        ),
        compiler_params=pltpu.CompilerParams(
            dimension_semantics=("parallel",),
            vmem_limit_bytes=vmem_limit_bytes,
        ),
    )(xp)

    if rows_pad != rows or D_pad != D:
        out = out[:rows, :D]
    return out.reshape(orig_shape)


def topk_reference(x: jax.Array, k: int) -> jax.Array:
    """Pure-JAX reference mirroring torch.topk + scatter semantics."""
    D = x.shape[-1]
    vals, idx = lax.top_k(x, k)
    vals = jnp.maximum(vals, jnp.zeros((), x.dtype))
    onehot = jax.nn.one_hot(idx, D, dtype=x.dtype)       # (..., k, D)
    return jnp.einsum("...k,...kd->...d", vals, onehot)


if __name__ == "__main__":
    key = jax.random.PRNGKey(0)
    batch, seq, hidden = 2, 8, 32
    k = 4

    # ----- float32 input: exercises the exact 2-reduce selection path -----
    x = jax.random.normal(key, (batch, seq, hidden), dtype=jnp.float32)
    out = jax.block_until_ready(topk_pallas(x, k))
    ref = topk_reference(x, k)
    assert out.shape == x.shape and out.dtype == x.dtype
    assert jnp.allclose(out, ref, atol=1e-6), "f32 mismatch vs reference"
    # at most k nonzeros per row (ReLU can zero some selected values)
    assert int(jnp.max(jnp.sum(out != 0, axis=-1))) <= k

    # ----- bfloat16 input: exercises the packed single-reduce path --------
    # Per-row-distinct values (exact in bf16) so the check does not depend on
    # tie-break order of the reference.
    base = (jnp.arange(hidden, dtype=jnp.float32) - 13.0) * 0.25
    pkeys = jax.random.split(jax.random.PRNGKey(1), batch * seq)
    xb = jax.vmap(lambda kk: jax.random.permutation(kk, base))(pkeys)
    xb = xb.astype(jnp.bfloat16).reshape(batch, seq, hidden)
    outb = jax.block_until_ready(topk_pallas(xb, k))
    refb = topk_reference(xb, k)
    assert outb.shape == xb.shape and outb.dtype == jnp.bfloat16
    assert jnp.allclose(outb.astype(jnp.float32), refb.astype(jnp.float32),
                        atol=1e-6), "bf16 mismatch vs reference"
    assert int(jnp.max(jnp.sum(outb != 0, axis=-1))) <= k

    print("KERNEL_OK")
</pallas_src>

<mosaic_0001>
module attributes {stable_mosaic.version = 11 : i64} {
  func.func @_topk_kernel(%arg0: i32, %arg1: memref<16x128xf32, #tpu.memory_space<vmem>>, %arg2: memref<16x128xf32, #tpu.memory_space<vmem>>) attributes {dimension_semantics = [#tpu.dimension_semantics<parallel>], iteration_bounds = array<i64: 1>, scalar_prefetch = 0 : i64, scratch_operands = 0 : i64, tpu.core_type = #tpu.core_type<tc>, window_params = [{transform_indices = @transform_0, window_bounds = array<i64: 16, 128>}, {transform_indices = @transform_1, window_bounds = array<i64: 16, 128>}]} {
    %0 = tpu.iota {dimensions = array<i32: 1>} : vector<1x128xi32>
    %c127_i32 = arith.constant 127 : i32
    %1 = vector.broadcast %c127_i32 : i32 to vector<1x128xi32>
    %2 = arith.subi %1, %0 : vector<1x128xi32>
    %false = arith.constant false
    %3 = vector.broadcast %false : i1 to vector<16x128xi1>
    %c0 = arith.constant 0 : index
    %c0_0 = arith.constant 0 : index
    %4 = vector.load %arg1[%c0, %c0_0] : memref<16x128xf32, #tpu.memory_space<vmem>>, vector<16x128xf32>
    %cst = arith.constant 0xFF800000 : f32
    %c0_i32 = arith.constant 0 : i32
    %cst_1 = arith.constant dense<0xFF800000> : vector<16xf32>
    %5 = vector.multi_reduction <maximumf>, %4, %cst_1 [1] : vector<16x128xf32> to vector<16xf32>
    %6 = vector.shape_cast %5 : vector<16xf32> to vector<16x1xf32>
    %7 = vector.broadcast %6 : vector<16x1xf32> to vector<16x128xf32>
    %8 = arith.cmpf oeq, %4, %7 : vector<16x128xf32>
    %c-1_i32 = arith.constant -1 : i32
    %9 = vector.shape_cast %2 : vector<1x128xi32> to vector<1x128xi32>
    %10 = vector.broadcast %9 : vector<1x128xi32> to vector<16x128xi32>
    %11 = vector.broadcast %c-1_i32 : i32 to vector<16x128xi32>
    %12 = arith.select %8, %10, %11 : vector<16x128xi1>, vector<16x128xi32>
    %cst_2 = arith.constant dense<-2147483648> : vector<16xi32>
    %13 = vector.multi_reduction <maxsi>, %12, %cst_2 [1] : vector<16x128xi32> to vector<16xi32>
    %14 = vector.shape_cast %13 : vector<16xi32> to vector<16x1xi32>
    %15 = vector.broadcast %2 : vector<1x128xi32> to vector<16x128xi32>
    %16 = vector.broadcast %14 : vector<16x1xi32> to vector<16x128xi32>
    %17 = arith.cmpi eq, %15, %16 : vector<16x128xi32>
    %18 = arith.ori %3, %17 : vector<16x128xi1>
    %19 = vector.broadcast %cst : f32 to vector<16x128xf32>
    %20 = arith.select %17, %19, %4 : vector<16x128xi1>, vector<16x128xf32>
    %c1_i32 = arith.constant 1 : i32
    %cst_3 = arith.constant dense<0xFF800000> : vector<16xf32>
    %21 = vector.multi_reduction <maximumf>, %20, %cst_3 [1] : vector<16x128xf32> to vector<16xf32>
    %22 = vector.shape_cast %21 : vector<16xf32> to vector<16x1xf32>
    %23 = vector.broadcast %22 : vector<16x1xf32> to vector<16x128xf32>
    %24 = arith.cmpf oeq, %20, %23 : vector<16x128xf32>
    %c-1_i32_4 = arith.constant -1 : i32
    %25 = vector.shape_cast %2 : vector<1x128xi32> to vector<1x128xi32>
    %26 = vector.broadcast %25 : vector<1x128xi32> to vector<16x128xi32>
    %27 = vector.broadcast %c-1_i32_4 : i32 to vector<16x128xi32>
    %28 = arith.select %24, %26, %27 : vector<16x128xi1>, vector<16x128xi32>
    %cst_5 = arith.constant dense<-2147483648> : vector<16xi32>
    %29 = vector.multi_reduction <maxsi>, %28, %cst_5 [1] : vector<16x128xi32> to vector<16xi32>
    %30 = vector.shape_cast %29 : vector<16xi32> to vector<16x1xi32>
    %31 = vector.broadcast %2 : vector<1x128xi32> to vector<16x128xi32>
    %32 = vector.broadcast %30 : vector<16x1xi32> to vector<16x128xi32>
    %33 = arith.cmpi eq, %31, %32 : vector<16x128xi32>
    %34 = arith.ori %18, %33 : vector<16x128xi1>
    %35 = vector.broadcast %cst : f32 to vector<16x128xf32>
    %36 = arith.select %33, %35, %20 : vector<16x128xi1>, vector<16x128xf32>
    %c2_i32 = arith.constant 2 : i32
    %cst_6 = arith.constant dense<0xFF800000> : vector<16xf32>
    %37 = vector.multi_reduction <maximumf>, %36, %cst_6 [1] : vector<16x128xf32> to vector<16xf32>
    %38 = vector.shape_cast %37 : vector<16xf32> to vector<16x1xf32>
    %39 = vector.broadcast %38 : vector<16x1xf32> to vector<16x128xf32>
    %40 = arith.cmpf oeq, %36, %39 : vector<16x128xf32>
    %c-1_i32_7 = arith.constant -1 : i32
    %41 = vector.shape_cast %2 : vector<1x128xi32> to vector<1x128xi32>
    %42 = vector.broadcast %41 : vector<1x128xi32> to vector<16x128xi32>
    %43 = vector.broadcast %c-1_i32_7 : i32 to vector<16x128xi32>
    %44 = arith.select %40, %42, %43 : vector<16x128xi1>, vector<16x128xi32>
    %cst_8 = arith.constant dense<-2147483648> : vector<16xi32>
    %45 = vector.multi_reduction <maxsi>, %44, %cst_8 [1] : vector<16x128xi32> to vector<16xi32>
    %46 = vector.shape_cast %45 : vector<16xi32> to vector<16x1xi32>
    %47 = vector.broadcast %2 : vector<1x128xi32> to vector<16x128xi32>
    %48 = vector.broadcast %46 : vector<16x1xi32> to vector<16x128xi32>
    %49 = arith.cmpi eq, %47, %48 : vector<16x128xi32>
    %50 = arith.ori %34, %49 : vector<16x128xi1>
    %51 = vector.broadcast %cst : f32 to vector<16x128xf32>
    %52 = arith.select %49, %51, %36 : vector<16x128xi1>, vector<16x128xf32>
    %c3_i32 = arith.constant 3 : i32
    %cst_9 = arith.constant dense<0xFF800000> : vector<16xf32>
    %53 = vector.multi_reduction <maximumf>, %52, %cst_9 [1] : vector<16x128xf32> to vector<16xf32>
    %54 = vector.shape_cast %53 : vector<16xf32> to vector<16x1xf32>
    %55 = vector.broadcast %54 : vector<16x1xf32> to vector<16x128xf32>
    %56 = arith.cmpf oeq, %52, %55 : vector<16x128xf32>
    %c-1_i32_10 = arith.constant -1 : i32
    %57 = vector.shape_cast %2 : vector<1x128xi32> to vector<1x128xi32>
    %58 = vector.broadcast %57 : vector<1x128xi32> to vector<16x128xi32>
    %59 = vector.broadcast %c-1_i32_10 : i32 to vector<16x128xi32>
    %60 = arith.select %56, %58, %59 : vector<16x128xi1>, vector<16x128xi32>
    %cst_11 = arith.constant dense<-2147483648> : vector<16xi32>
    %61 = vector.multi_reduction <maxsi>, %60, %cst_11 [1] : vector<16x128xi32> to vector<16xi32>
    %62 = vector.shape_cast %61 : vector<16xi32> to vector<16x1xi32>
    %63 = vector.broadcast %2 : vector<1x128xi32> to vector<16x128xi32>
    %64 = vector.broadcast %62 : vector<16x1xi32> to vector<16x128xi32>
    %65 = arith.cmpi eq, %63, %64 : vector<16x128xi32>
    %66 = arith.ori %50, %65 : vector<16x128xi1>
    %67 = vector.broadcast %cst : f32 to vector<16x128xf32>
    %68 = arith.select %65, %67, %52 : vector<16x128xi1>, vector<16x128xf32>
    %c0_12 = arith.constant 0 : index
    %c0_13 = arith.constant 0 : index
    %69 = vector.load %arg1[%c0_12, %c0_13] : memref<16x128xf32, #tpu.memory_space<vmem>>, vector<16x128xf32>
    %cst_14 = arith.constant 0.000000e+00 : f32
    %70 = vector.broadcast %cst_14 : f32 to vector<16x128xf32>
    %71 = arith.maximumf %69, %70 : vector<16x128xf32>
    %cst_15 = arith.constant 0.000000e+00 : f32
    %72 = vector.broadcast %cst_15 : f32 to vector<16x128xf32>
    %73 = arith.select %66, %71, %72 : vector<16x128xi1>, vector<16x128xf32>
    %c0_16 = arith.constant 0 : index
    %c0_17 = arith.constant 0 : index
    %74 = vector.load %arg2[%c0_16, %c0_17] : memref<16x128xf32, #tpu.memory_space<vmem>>, vector<16x128xf32>
    tpu.vector_store %arg2[%c0_16, %c0_17], %73 {strides = array<i32>} : memref<16x128xf32, #tpu.memory_space<vmem>>, vector<16x128xf32>,
    return
  }
  func.func @transform_0(%arg0: i32) -> (i32, i32) {
    %c0_i32 = arith.constant 0 : i32
    %c0_i32_0 = arith.constant 0 : i32
    return %arg0, %c0_i32 : i32, i32
  }
  func.func @transform_1(%arg0: i32) -> (i32, i32) {
    %c0_i32 = arith.constant 0 : i32
    %c0_i32_0 = arith.constant 0 : i32
    return %arg0, %c0_i32 : i32, i32
  }
}

</mosaic_0001>

<bundles_post_ra>
// kernel: tpu_custom_call.1
= control target key start
LH: loop header
LB: loop body
LE: loop exit
PB: predicated region body
PF: predicated region fallthrough
CT: control target
= control target key end

     0   :  { %6 = vsyncpa [#allocation3], 0  ;;  %s379_s0 = inlined_call_operand.hbm [shape: f32[16,128], index: 0, kind: input, shape index: {}]   ;;  %s380_s1 = inlined_call_operand.hbm [shape: f32[16,128], index: 1, kind: output, shape index: {}]  }
   0x1   :  { %7 = vsyncpa [#allocation4], 0  ;;  %s267_s6 = smov [#allocation2]   ;;  %s219_s10 = scalar_lea.hbm %s379_s0, 256 }
   0x2   :  { %s13_s7 = sshll.u32 %s267_s6, 4  ;;  %p220_p0 = scmp.ne.s32.totalorder %s379_s0, %s219_s10  ;;  %s14_s7 = int_to_ptr.vmem [resolvable:$true] %s13_s7 }
   0x3   :  { %p223_p1 = scmp.lt.u32.totalorder %s219_s10, %s379_s0 }
   0x5   :  { %p225_p2 = pnand %p223_p1, %p220_p0 }
   0x7   :  { %228 = shalt.err (!%p225_p2)
}
   0x8   :  { %s229_s15 = scalar_lea.vmem %s14_s7, 256  ;;  %p234_p4 = scmp.lt.s32.totalorder %s14_s7, %s14_s7 }
   0x9   :  { %p230_p3 = scmp.ne.s32.totalorder %s14_s7, %s229_s15  ;;  %p235_p5 = scmp.lt.s32.totalorder %s229_s15, %s229_s15 }
   0xb   :  { %p236_p6 = por %p235_p5, %p234_p4 }
   0xd   :  { %p237_p7 = pnand %p236_p6, %p230_p3 }
   0xf   :  { %240 = shalt.err (!%p237_p7)
}
  0x10   :  { %s268_s16 = smov 128   ;;  %s269_s17 = smov 8  }
  0x11   :  { %19 = dma.hbm_to_vmem [thread:$0]  %s379_s0, 256, %s14_s7, [#allocation3], %s268_s16, %s268_s16, %s269_s17  }
  0x12   :  { %263 = dma.done.wait [#allocation3], 256  }
  0x13   :  { %264 = vsyncadd [#allocation3], 4294967040  ;;  %v296_v0 = vld [vmem:[#allocation2] sm:$0xff]  ;;  %v299_v1 = vld [vmem:[#allocation2 + $0x8] sm:$0xff]  ;;  %v23_v2 = vlaneseq  ;;  %s270_s0 = smov [#allocation5]  }
  0x14   :  { %28 = vmax.xlane.f32.xlu0 %v296_v0  ;;  %s203_s20 = sshll.u32 %s270_s0, 4  ;;  %s204_s20 = int_to_ptr.vmem [resolvable:$true] %s203_s20 }
  0x15   :  { %v24_v3 = vand.u32 127, %v23_v2  ;;  %s241_s21 = scalar_lea.vmem %s204_s20, 256  ;;  %p246_p9 = scmp.lt.s32.totalorder %s204_s20, %s204_s20 }
  0x16   :  { %p242_p8 = scmp.ne.s32.totalorder %s204_s20, %s241_s21  ;;  %p247_p10 = scmp.lt.s32.totalorder %s241_s21, %s241_s21 }
  0x17   :  { %v302_v4 = vsub.s32 127, %v24_v3 }
  0x18   :  { %30 = vmax.xlane.f32.xlu0 %v299_v1  ;;  %p248_p11 = por %p247_p10, %p246_p9 }
  0x1a   :  { %p249_p12 = pnand %p248_p11, %p242_p8 }
  0xa1   :  { %v29_v5 = vpop.xlane.xlu0 %28 }
  0xa2   :  { %vm32_vm0 = vcmp.eq.f32.partialorder %v296_v0, %v29_v5 }
  0xa3   :  { %v34_v6 = vsel %vm32_vm0, %v302_v4, 4294967295 }
  0xa4   :  { %v37_v7 = vshra.s32 %v34_v6, 16  ;;  %v36_v13 = vand.u32 65535, %v34_v6 }
  0xa5   :  { %v31_v8 = vpop.xlane.xlu0 %30 }
  0xa6   :  { %vm33_vm1 = vcmp.eq.f32.partialorder %v299_v1, %v31_v8  ;;  %v39_v9 = vcvt.s32.f32 %v37_v7  ;;  %v38_v16 = vcvt.s32.f32 %v36_v13 }
  0xa7   :  { %v35_v10 = vsel %vm33_vm1, %v302_v4, 4294967295 }
  0xa8   :  { %40 = vmax.xlane.f32.xlu1 %v39_v9  ;;  %v51_v11 = vshra.s32 %v35_v10, 16  ;;  %v50_v14 = vand.u32 65535, %v35_v10 }
  0xaa   :  { %v53_v12 = vcvt.s32.f32 %v51_v11  ;;  %v52_v19 = vcvt.s32.f32 %v50_v14 }
  0xac   :  { %54 = vmax.xlane.f32.xlu1 %v53_v12 }
 0x135   :  { %v41_v15 = vpop.xlane.xlu1 %40 }
 0x136   :  { %vm42_vm2 = vcmp.eq.f32.partialorder %v39_v9, %v41_v15  ;;  %v47_v21 = vcvt.f32.s32 %v41_v15 }
 0x137   :  { %v43_v17 = vsel %vm42_vm2, %v38_v16, -inf }
 0x138   :  { %44 = vmax.xlane.f32.xlu0 %v43_v17  ;;  %v48_v23 = vshll.u32 %v47_v21, 16 }
 0x139   :  { %v55_v18 = vpop.xlane.xlu1 %54 }
 0x13a   :  { %vm56_vm3 = vcmp.eq.f32.partialorder %v53_v12, %v55_v18  ;;  %v61_v24 = vcvt.f32.s32 %v55_v18 }
 0x13b   :  { %v57_v20 = vsel %vm56_vm3, %v52_v19, -inf }
 0x13c   :  { %58 = vmax.xlane.f32.xlu1 %v57_v20  ;;  %v62_v28 = vshll.u32 %v61_v24, 16 }
 0x1c5   :  { %v45_v22 = vpop.xlane.xlu0 %44 }
 0x1c6   :  { %v46_v25 = vcvt.f32.s32 %v45_v22 }
 0x1c8   :  { %v308_v26 = vadd.s32 %v48_v23, %v46_v25 }
 0x1c9   :  { %v59_v27 = vpop.xlane.xlu1 %58 }
 0x1ca   :  { %v60_v29 = vcvt.f32.s32 %v59_v27  ;;  %vm64_vm4 = vcmp.eq.s32.totalorder %v302_v4, %v308_v26 }
 0x1cb   :  { %v66_v30 = vsel %vm64_vm4, -inf, %v296_v0 }
 0x1cc   :  { %v316_v31 = vadd.s32 %v62_v28, %v60_v29  ;;  %68 = vmax.xlane.f32.xlu0 %v66_v30 }
 0x1ce   :  { %vm65_vm5 = vcmp.eq.s32.totalorder %v302_v4, %v316_v31 }
 0x1cf   :  { %v67_v32 = vsel %vm65_vm5, -inf, %v299_v1 }
 0x1d0   :  { %70 = vmax.xlane.f32.xlu1 %v67_v32 }
 0x259   :  { %v69_v33 = vpop.xlane.xlu0 %68 }
 0x25a   :  { %vm72_vm6 = vcmp.eq.f32.partialorder %v66_v30, %v69_v33 }
 0x25b   :  { %v74_v34 = vsel %vm72_vm6, %v302_v4, 4294967295 }
 0x25c   :  { %v77_v35 = vshra.s32 %v74_v34, 16  ;;  %v76_v41 = vand.u32 65535, %v74_v34 }
 0x25d   :  { %v71_v36 = vpop.xlane.xlu1 %70 }
 0x25e   :  { %vm73_vm7 = vcmp.eq.f32.partialorder %v67_v32, %v71_v36  ;;  %v79_v37 = vcvt.s32.f32 %v77_v35  ;;  %v78_v44 = vcvt.s32.f32 %v76_v41 }
 0x25f   :  { %v75_v38 = vsel %vm73_vm7, %v302_v4, 4294967295 }
 0x260   :  { %80 = vmax.xlane.f32.xlu0 %v79_v37  ;;  %v91_v39 = vshra.s32 %v75_v38, 16  ;;  %v90_v42 = vand.u32 65535, %v75_v38 }
 0x262   :  { %v93_v40 = vcvt.s32.f32 %v91_v39  ;;  %v92_v47 = vcvt.s32.f32 %v90_v42 }
 0x264   :  { %94 = vmax.xlane.f32.xlu1 %v93_v40 }
 0x2ed   :  { %v81_v43 = vpop.xlane.xlu0 %80 }
 0x2ee   :  { %vm82_vm8 = vcmp.eq.f32.partialorder %v79_v37, %v81_v43  ;;  %v87_v49 = vcvt.f32.s32 %v81_v43 }
 0x2ef   :  { %v83_v45 = vsel %vm82_vm8, %v78_v44, -inf }
 0x2f0   :  { %84 = vmax.xlane.f32.xlu0 %v83_v45  ;;  %v88_v51 = vshll.u32 %v87_v49, 16 }
 0x2f1   :  { %v95_v46 = vpop.xlane.xlu1 %94 }
 0x2f2   :  { %vm96_vm9 = vcmp.eq.f32.partialorder %v93_v40, %v95_v46  ;;  %v101_v52 = vcvt.f32.s32 %v95_v46 }
 0x2f3   :  { %v97_v48 = vsel %vm96_vm9, %v92_v47, -inf }
 0x2f4   :  { %98 = vmax.xlane.f32.xlu1 %v97_v48  ;;  %v102_v56 = vshll.u32 %v101_v52, 16  ;;  %v192_v52 = vmax.f32 %v296_v0, 0.0 }
 0x37d   :  { %v85_v50 = vpop.xlane.xlu0 %84 }
 0x37e   :  { %v86_v53 = vcvt.f32.s32 %v85_v50 }
 0x380   :  { %v89_v54 = vadd.s32 %v88_v51, %v86_v53 }
 0x381   :  { %v99_v55 = vpop.xlane.xlu1 %98 }
 0x382   :  { %v100_v57 = vcvt.f32.s32 %v99_v55  ;;  %vm104_vm10 = vcmp.eq.s32.totalorder %v302_v4, %v89_v54 }
 0x383   :  { %v108_v58 = vsel %vm104_vm10, -inf, %v66_v30  ;;  %vm106_vm1 = vmor %vm64_vm4, %vm104_vm10 }
 0x384   :  { %v103_v59 = vadd.s32 %v102_v56, %v100_v57  ;;  %110 = vmax.xlane.f32.xlu0 %v108_v58  ;;  %v193_v57 = vmax.f32 %v299_v1, 0.0 }
 0x386   :  { %vm105_vm11 = vcmp.eq.s32.totalorder %v302_v4, %v103_v59 }
 0x387   :  { %v109_v60 = vsel %vm105_vm11, -inf, %v67_v32  ;;  %vm107_vm6 = vmor %vm65_vm5, %vm105_vm11 }
 0x388   :  { %112 = vmax.xlane.f32.xlu1 %v109_v60 }
 0x411   :  { %v111_v61 = vpop.xlane.xlu0 %110 }
 0x412   :  { %vm114_vm12 = vcmp.eq.f32.partialorder %v108_v58, %v111_v61 }
 0x413   :  { %v116_v62 = vsel %vm114_vm12, %v302_v4, 4294967295 }
 0x414   :  { %v119_v63 = vshra.s32 %v116_v62, 16  ;;  %v118_v8 = vand.u32 65535, %v116_v62 }
 0x415   :  { %v113_v2 = vpop.xlane.xlu1 %112 }
 0x416   :  { %vm115_vm13 = vcmp.eq.f32.partialorder %v109_v60, %v113_v2  ;;  %v121_v3 = vcvt.s32.f32 %v119_v63  ;;  %v120_v11 = vcvt.s32.f32 %v118_v8 }
 0x417   :  { %v117_v5 = vsel %vm115_vm13, %v302_v4, 4294967295 }
 0x418   :  { %122 = vmax.xlane.f32.xlu0 %v121_v3  ;;  %v133_v6 = vshra.s32 %v117_v5, 16  ;;  %v132_v9 = vand.u32 65535, %v117_v5 }
 0x41a   :  { %v135_v7 = vcvt.s32.f32 %v133_v6  ;;  %v134_v14 = vcvt.s32.f32 %v132_v9 }
 0x41c   :  { %136 = vmax.xlane.f32.xlu1 %v135_v7 }
 0x4a5   :  { %v123_v10 = vpop.xlane.xlu0 %122 }
 0x4a6   :  { %vm124_vm14 = vcmp.eq.f32.partialorder %v121_v3, %v123_v10  ;;  %v129_v16 = vcvt.f32.s32 %v123_v10 }
 0x4a7   :  { %v125_v12 = vsel %vm124_vm14, %v120_v11, -inf }
 0x4a8   :  { %126 = vmax.xlane.f32.xlu0 %v125_v12  ;;  %v130_v18 = vshll.u32 %v129_v16, 16 }
 0x4a9   :  { %v137_v13 = vpop.xlane.xlu1 %136 }
 0x4aa   :  { %vm138_vm15 = vcmp.eq.f32.partialorder %v135_v7, %v137_v13  ;;  %v143_v19 = vcvt.f32.s32 %v137_v13 }
 0x4ab   :  { %v139_v15 = vsel %vm138_vm15, %v134_v14, -inf }
 0x4ac   :  { %140 = vmax.xlane.f32.xlu1 %v139_v15  ;;  %v144_v23 = vshll.u32 %v143_v19, 16 }
 0x535   :  { %v127_v17 = vpop.xlane.xlu0 %126 }
 0x536   :  { %v128_v20 = vcvt.f32.s32 %v127_v17 }
 0x538   :  { %v131_v21 = vadd.s32 %v130_v18, %v128_v20 }
 0x539   :  { %v141_v22 = vpop.xlane.xlu1 %140 }
 0x53a   :  { %v142_v24 = vcvt.f32.s32 %v141_v22  ;;  %vm146_vm0 = vcmp.eq.s32.totalorder %v302_v4, %v131_v21 }
 0x53b   :  { %v150_v25 = vsel %vm146_vm0, -inf, %v108_v58  ;;  %vm340_vm2 = vmor %vm106_vm1, %vm146_vm0 }
 0x53c   :  { %v145_v28 = vadd.s32 %v144_v23, %v142_v24  ;;  %152 = vmax.xlane.f32.xlu0 %v150_v25 }
 0x53e   :  { %vm147_vm3 = vcmp.eq.s32.totalorder %v302_v4, %v145_v28 }
 0x53f   :  { %v151_v29 = vsel %vm147_vm3, -inf, %v109_v60  ;;  %vm350_vm7 = vmor %vm107_vm6, %vm147_vm3 }
 0x540   :  { %154 = vmax.xlane.f32.xlu1 %v151_v29 }
 0x5c9   :  { %v153_v26 = vpop.xlane.xlu0 %152 }
 0x5ca   :  { %vm156_vm4 = vcmp.eq.f32.partialorder %v150_v25, %v153_v26 }
 0x5cb   :  { %v158_v32 = vsel %vm156_vm4, %v302_v4, 4294967295 }
 0x5cc   :  { %v161_v33 = vshra.s32 %v158_v32, 16  ;;  %v160_v38 = vand.u32 65535, %v158_v32 }
 0x5cd   :  { %v155_v34 = vpop.xlane.xlu1 %154 }
 0x5ce   :  { %vm157_vm8 = vcmp.eq.f32.partialorder %v151_v29, %v155_v34  ;;  %v163_v35 = vcvt.s32.f32 %v161_v33  ;;  %v162_v41 = vcvt.s32.f32 %v160_v38 }
 0x5cf   :  { %v159_v36 = vsel %vm157_vm8, %v302_v4, 4294967295 }
 0x5d0   :  { %164 = vmax.xlane.f32.xlu0 %v163_v35  ;;  %v175_v37 = vshra.s32 %v159_v36, 16  ;;  %v174_v39 = vand.u32 65535, %v159_v36 }
 0x5d2   :  { %v177_v31 = vcvt.s32.f32 %v175_v37  ;;  %v176_v44 = vcvt.s32.f32 %v174_v39 }
 0x5d4   :  { %178 = vmax.xlane.f32.xlu1 %v177_v31 }
 0x65d   :  { %v165_v40 = vpop.xlane.xlu0 %164 }
 0x65e   :  { %vm166_vm5 = vcmp.eq.f32.partialorder %v163_v35, %v165_v40  ;;  %v171_v46 = vcvt.f32.s32 %v165_v40 }
 0x65f   :  { %v167_v42 = vsel %vm166_vm5, %v162_v41, -inf }
 0x660   :  { %168 = vmax.xlane.f32.xlu0 %v167_v42  ;;  %v172_v48 = vshll.u32 %v171_v46, 16 }
 0x661   :  { %v179_v43 = vpop.xlane.xlu1 %178 }
 0x662   :  { %vm180_vm9 = vcmp.eq.f32.partialorder %v177_v31, %v179_v43  ;;  %v185_v49 = vcvt.f32.s32 %v179_v43 }
 0x663   :  { %v181_v45 = vsel %vm180_vm9, %v176_v44, -inf }
 0x664   :  { %182 = vmax.xlane.f32.xlu1 %v181_v45  ;;  %v186_v54 = vshll.u32 %v185_v49, 16 }
 0x6ed   :  { %v169_v47 = vpop.xlane.xlu0 %168 }
 0x6ee   :  { %v170_v50 = vcvt.f32.s32 %v169_v47 }
 0x6f0   :  { %v173_v51 = vadd.s32 %v172_v48, %v170_v50 }
 0x6f1   :  { %v183_v53 = vpop.xlane.xlu1 %182 }
 0x6f2   :  { %vm188_vm10 = vcmp.eq.s32.totalorder %v302_v4, %v173_v51  ;;  %v184_v55 = vcvt.f32.s32 %v183_v53 }
 0x6f3   :  { %vm190_vm11 = vmor %vm340_vm2, %vm188_vm10 }
 0x6f4   :  { %v187_v56 = vadd.s32 %v186_v54, %v184_v55  ;;  %v194_v58 = vsel %vm190_vm11, %v192_v52, 0.0 }
 0x6f5   :  { %196 = vst [vmem:[#allocation5] sm:$0xff] %v194_v58 }
 0x6f6   :  { %vm189_vm12 = vcmp.eq.s32.totalorder %v302_v4, %v187_v56 }
 0x6f7   :  { %vm191_vm13 = vmor %vm350_vm7, %vm189_vm12 }
 0x6f8   :  { %v195_v0 = vsel %vm191_vm13, %v193_v57, 0.0 }
 0x6f9   :  { %197 = vst [vmem:[#allocation5 + $0x8] sm:$0xff] %v195_v0 }
 0x6fa   :  { %252 = shalt.err (!%p249_p12)
}
 0x6fb   :  { %s253_s24 = scalar_lea.hbm %s380_s1, 256 }
 0x6fc   :  { %p254_p13 = scmp.ne.s32.totalorder %s380_s1, %s253_s24  ;;  %p257_p0 = scmp.lt.u32.totalorder %s253_s24, %s380_s1 }
 0x6fe   :  { %p259_p1 = pnand %p257_p0, %p254_p13 }
 0x700   :  { %262 = shalt.err (!%p259_p1)
}
 0x701   :  { %209 = dma.vmem_to_hbm [thread:$0]  %s204_s20, 256, %s380_s1, [#allocation4], %s268_s16, %s268_s16, %s269_s17  }
 0x702   :  { %265 = dma.done.wait [#allocation4], 256  }
 0x703   :  { %266 = vsyncadd [#allocation4], 4294967040 }
 0x704   :  { %213 = vsyncpa [#allocation3], 1 }
 0x705   :  { %214 = vsyncpa [#allocation4], 1 }

</bundles_post_ra>
